<compile_context>
chip_gen: v7x
topology: tpu7x:2x2x1
jax: 0.10.0
libtpu: 0.0.40
codegen_flags: <defaults>
</compile_context>

<pallas_src>
import jax
import jax.numpy as jnp
from jax.experimental import pallas as pl
from jax.experimental.pallas import tpu as pltpu


def lstm_kernel(x_ref, p_ref, out_ref):
    # x_ref:   (B, T*I) f32  flattened input; x[b, t*I + i] == x[b, t, i]
    # p_ref:   (I+3, 4H) f32 packed params slab:
    #            rows 0..I-1 : W_ih^T        (g-gate column pre-scaled by 2)
    #            row  I      : b_ih + b_hh   (g column pre-scaled by 2)
    #            row  I+1    : W_hh^T row    (g column pre-scaled by 2)
    #            row  I+2    : [w_out, b_out, 0, 0]
    # out_ref: (B, 3) f32    packed [y, h_n, c_n], single store
    B = x_ref.shape[0]
    ROWS, G = p_ref.shape
    I = ROWS - 3
    H = G // 4
    T = x_ref.shape[1] // I

    xv = x_ref[...]                      # one vld: whole input is a single tile
    p = p_ref[...]                       # one vld: whole param slab is a single tile

    wih = p[0:I, :]                      # (I, 4H)
    bias = p[I:I + 1, :]                 # (1, 4H)
    whh = p[I + 1:I + 2, :]              # (1, 4H)
    wout = p[I + 2:I + 3, 0:1]           # (1, 1)
    bout = p[I + 2:I + 3, 1:2]           # (1, 1)

    h = jnp.zeros((B, H), jnp.float32)
    c = jnp.zeros((B, H), jnp.float32)

    # Fully unrolled static recurrence (T small, static): scheduler can overlap the
    # next step's VPU projection MACs with the previous step's EUP latency.
    for t in range(T):
        # Fused input projection + recurrence term, strictly on the VPU (no vmatmul):
        # broadcast outer products (B,1)*(1,4H) accumulated over I features.
        gates = bias + h * whh
        for i in range(I):
            gates = gates + xv[:, t * I + i:t * I + i + 1] * wih[i:i + 1, :]

        # One sigmoid EUP push over the whole (B,4H) vreg; tanh(g) recovered from the
        # pre-scaled g column via tanh(z) = 2*sigmoid(2z) - 1.
        sg = jax.nn.sigmoid(gates)
        i_g = sg[:, 0 * H:1 * H]
        f_g = sg[:, 1 * H:2 * H]
        g_g = 2.0 * sg[:, 2 * H:3 * H] - 1.0
        o_g = sg[:, 3 * H:4 * H]

        c = f_g * c + i_g * g_g
        h = o_g * jnp.tanh(c)            # second (and last) EUP push of the step

    # Linear(1,1) head as a scalar FMA on the VPU.
    y = h * wout + bout

    # Single packed store: select y / h / c into lanes 0 / 1 / 2.
    lane = jax.lax.broadcasted_iota(jnp.int32, (B, 3), 1)
    out_ref[...] = jnp.where(lane == 0, y, jnp.where(lane == 1, h, c))


def lstm_model_forward(x, params):
    """x: (B, T, I) float32. Returns (y, (h_n, c_n)) like the PyTorch module."""
    w_ih, w_hh, b_ih, b_hh, w_out, b_out = params
    B, T, I = x.shape
    H = w_hh.shape[1]
    assert H == 1, "kernel path is specialized for hidden_size=1 (as fixed by the module)"

    f32 = jnp.float32
    # Pre-scale the g-gate column by 2 (free, wrapper-side) so the kernel can use the
    # identity tanh(z) = 2*sigmoid(2z) - 1 out of a single sigmoid push.
    gscale = jnp.ones((4 * H,), f32).at[2 * H:3 * H].set(2.0)

    wih_t = w_ih.astype(f32).T * gscale[None, :]                 # (I, 4H)
    bias = ((b_ih + b_hh).astype(f32) * gscale)[None, :]         # (1, 4H)
    whh_t = w_hh.astype(f32).T * gscale[None, :]                 # (H, 4H) = (1, 4)
    head = jnp.concatenate(
        [w_out.astype(f32).reshape(1, 1),
         b_out.astype(f32).reshape(1, 1),
         jnp.zeros((1, 4 * H - 2), f32)], axis=1)                # (1, 4H)
    params_slab = jnp.concatenate([wih_t, bias, whh_t, head], axis=0)   # (I+3, 4H)

    x_flat = x.astype(f32).reshape(B, T * I)   # contiguous reshape (no data movement)

    vmem = pl.BlockSpec(memory_space=pltpu.MemorySpace.VMEM)
    packed = pl.pallas_call(
        lstm_kernel,
        out_shape=jax.ShapeDtypeStruct((B, 3), f32),
        in_specs=[vmem, vmem],
        out_specs=vmem,
    )(x_flat, params_slab)

    y = packed[:, 0:1]
    h_n = packed[:, 1:2].reshape(1, B, H)      # PyTorch: (num_layers=1, B, H)
    c_n = packed[:, 2:3].reshape(1, B, H)
    return y, (h_n, c_n)


def lstm_model_reference(x, params):
    """Pure-JAX reference (mirrors torch.nn.LSTM + Linear semantics)."""
    w_ih, w_hh, b_ih, b_hh, w_out, b_out = params
    B, T, I = x.shape
    H = w_hh.shape[1]
    h = jnp.zeros((B, H), jnp.float32)
    c = jnp.zeros((B, H), jnp.float32)
    for t in range(T):
        xt = x[:, t, :]
        gates = xt @ w_ih.T + h @ w_hh.T + b_ih + b_hh
        i_g = jax.nn.sigmoid(gates[:, 0 * H:1 * H])
        f_g = jax.nn.sigmoid(gates[:, 1 * H:2 * H])
        g_g = jnp.tanh(gates[:, 2 * H:3 * H])
        o_g = jax.nn.sigmoid(gates[:, 3 * H:4 * H])
        c = f_g * c + i_g * g_g
        h = o_g * jnp.tanh(c)
    y = h @ w_out.T + b_out
    return y, (h.reshape(1, B, H), c.reshape(1, B, H))


def init_params(key, input_size=5, hidden_size=1):
    # Deterministic init matching PyTorch LSTM/Linear shapes
    # (uniform in [-1/sqrt(H), 1/sqrt(H)]); synthetic, not a checkpoint load.
    H, I = hidden_size, input_size
    ks = jax.random.split(key, 6)
    bound = 1.0 / jnp.sqrt(jnp.float32(H))
    u = lambda k, shape: jax.random.uniform(k, shape, jnp.float32, -bound, bound)
    w_ih = u(ks[0], (4 * H, I))    # lstm1.weight_ih_l0
    w_hh = u(ks[1], (4 * H, H))    # lstm1.weight_hh_l0
    b_ih = u(ks[2], (4 * H,))      # lstm1.bias_ih_l0
    b_hh = u(ks[3], (4 * H,))      # lstm1.bias_hh_l0
    w_out = u(ks[4], (1, H))       # out.weight
    b_out = u(ks[5], (1,))         # out.bias
    return (w_ih, w_hh, b_ih, b_hh, w_out, b_out)


if __name__ == "__main__":
    key = jax.random.PRNGKey(0)
    k_param, k_x = jax.random.split(key)

    B, T, I, H = 2, 8, 5, 1
    params = init_params(k_param, input_size=I, hidden_size=H)
    x = jax.random.normal(k_x, (B, T, I), jnp.float32)

    fwd = jax.jit(lstm_model_forward)   # keep wrapper packing + kernel in one dispatch
    y, (h_n, c_n) = fwd(x, params)
    jax.block_until_ready((y, h_n, c_n))

    y_ref, (h_ref, c_ref) = lstm_model_reference(x, params)
    assert y.shape == (B, 1) and h_n.shape == (1, B, H) and c_n.shape == (1, B, H)
    assert jnp.allclose(y, y_ref, atol=1e-5)
    assert jnp.allclose(h_n, h_ref, atol=1e-5)
    assert jnp.allclose(c_n, c_ref, atol=1e-5)

    print("KERNEL_OK")
</pallas_src>

<mosaic_0001>
module attributes {stable_mosaic.version = 11 : i64} {
  func.func @lstm_kernel(%arg0: memref<2x40xf32, #tpu.memory_space<vmem>>, %arg1: memref<8x4xf32, #tpu.memory_space<vmem>>, %arg2: memref<2x3xf32, #tpu.memory_space<vmem>>) attributes {dimension_semantics = [], scalar_prefetch = 0 : i64, scratch_operands = 0 : i64, tpu.core_type = #tpu.core_type<tc>} {
    %c0 = arith.constant 0 : index
    %c0_0 = arith.constant 0 : index
    %0 = vector.load %arg0[%c0, %c0_0] : memref<2x40xf32, #tpu.memory_space<vmem>>, vector<2x40xf32>
    %c0_1 = arith.constant 0 : index
    %c0_2 = arith.constant 0 : index
    %1 = vector.load %arg1[%c0_1, %c0_2] : memref<8x4xf32, #tpu.memory_space<vmem>>, vector<8x4xf32>
    %2 = vector.extract_strided_slice %1 {offsets = [0, 0], sizes = [5, 4], strides = [1, 1]} : vector<8x4xf32> to vector<5x4xf32>
    %3 = vector.extract_strided_slice %1 {offsets = [5, 0], sizes = [1, 4], strides = [1, 1]} : vector<8x4xf32> to vector<1x4xf32>
    %4 = vector.extract_strided_slice %1 {offsets = [6, 0], sizes = [1, 4], strides = [1, 1]} : vector<8x4xf32> to vector<1x4xf32>
    %5 = vector.extract_strided_slice %1 {offsets = [7, 0], sizes = [1, 1], strides = [1, 1]} : vector<8x4xf32> to vector<1x1xf32>
    %6 = vector.extract_strided_slice %1 {offsets = [7, 1], sizes = [1, 1], strides = [1, 1]} : vector<8x4xf32> to vector<1x1xf32>
    %cst = arith.constant 0.000000e+00 : f32
    %7 = vector.broadcast %cst : f32 to vector<2x1xf32>
    %cst_3 = arith.constant 0.000000e+00 : f32
    %8 = vector.broadcast %cst_3 : f32 to vector<2x1xf32>
    %9 = vector.broadcast %7 : vector<2x1xf32> to vector<2x4xf32>
    %10 = vector.broadcast %4 : vector<1x4xf32> to vector<2x4xf32>
    %11 = arith.mulf %9, %10 : vector<2x4xf32>
    %12 = vector.broadcast %3 : vector<1x4xf32> to vector<2x4xf32>
    %13 = arith.addf %12, %11 : vector<2x4xf32>
    %14 = vector.extract_strided_slice %0 {offsets = [0, 0], sizes = [2, 1], strides = [1, 1]} : vector<2x40xf32> to vector<2x1xf32>
    %15 = vector.extract_strided_slice %2 {offsets = [0, 0], sizes = [1, 4], strides = [1, 1]} : vector<5x4xf32> to vector<1x4xf32>
    %16 = vector.broadcast %14 : vector<2x1xf32> to vector<2x4xf32>
    %17 = vector.broadcast %15 : vector<1x4xf32> to vector<2x4xf32>
    %18 = arith.mulf %16, %17 : vector<2x4xf32>
    %19 = arith.addf %13, %18 : vector<2x4xf32>
    %20 = vector.extract_strided_slice %0 {offsets = [0, 1], sizes = [2, 1], strides = [1, 1]} : vector<2x40xf32> to vector<2x1xf32>
    %21 = vector.extract_strided_slice %2 {offsets = [1, 0], sizes = [1, 4], strides = [1, 1]} : vector<5x4xf32> to vector<1x4xf32>
    %22 = vector.broadcast %20 : vector<2x1xf32> to vector<2x4xf32>
    %23 = vector.broadcast %21 : vector<1x4xf32> to vector<2x4xf32>
    %24 = arith.mulf %22, %23 : vector<2x4xf32>
    %25 = arith.addf %19, %24 : vector<2x4xf32>
    %26 = vector.extract_strided_slice %0 {offsets = [0, 2], sizes = [2, 1], strides = [1, 1]} : vector<2x40xf32> to vector<2x1xf32>
    %27 = vector.extract_strided_slice %2 {offsets = [2, 0], sizes = [1, 4], strides = [1, 1]} : vector<5x4xf32> to vector<1x4xf32>
    %28 = vector.broadcast %26 : vector<2x1xf32> to vector<2x4xf32>
    %29 = vector.broadcast %27 : vector<1x4xf32> to vector<2x4xf32>
    %30 = arith.mulf %28, %29 : vector<2x4xf32>
    %31 = arith.addf %25, %30 : vector<2x4xf32>
    %32 = vector.extract_strided_slice %0 {offsets = [0, 3], sizes = [2, 1], strides = [1, 1]} : vector<2x40xf32> to vector<2x1xf32>
    %33 = vector.extract_strided_slice %2 {offsets = [3, 0], sizes = [1, 4], strides = [1, 1]} : vector<5x4xf32> to vector<1x4xf32>
    %34 = vector.broadcast %32 : vector<2x1xf32> to vector<2x4xf32>
    %35 = vector.broadcast %33 : vector<1x4xf32> to vector<2x4xf32>
    %36 = arith.mulf %34, %35 : vector<2x4xf32>
    %37 = arith.addf %31, %36 : vector<2x4xf32>
    %38 = vector.extract_strided_slice %0 {offsets = [0, 4], sizes = [2, 1], strides = [1, 1]} : vector<2x40xf32> to vector<2x1xf32>
    %39 = vector.extract_strided_slice %2 {offsets = [4, 0], sizes = [1, 4], strides = [1, 1]} : vector<5x4xf32> to vector<1x4xf32>
    %40 = vector.broadcast %38 : vector<2x1xf32> to vector<2x4xf32>
    %41 = vector.broadcast %39 : vector<1x4xf32> to vector<2x4xf32>
    %42 = arith.mulf %40, %41 : vector<2x4xf32>
    %43 = arith.addf %37, %42 : vector<2x4xf32>
    %44 = arith.negf %43 : vector<2x4xf32>
    %45 = math.exp %44 : vector<2x4xf32>
    %cst_4 = arith.constant 1.000000e+00 : f32
    %46 = vector.broadcast %cst_4 : f32 to vector<2x4xf32>
    %47 = arith.addf %46, %45 : vector<2x4xf32>
    %48 = arith.divf %46, %47 : vector<2x4xf32>
    %49 = vector.extract_strided_slice %48 {offsets = [0, 0], sizes = [2, 1], strides = [1, 1]} : vector<2x4xf32> to vector<2x1xf32>
    %50 = vector.extract_strided_slice %48 {offsets = [0, 1], sizes = [2, 1], strides = [1, 1]} : vector<2x4xf32> to vector<2x1xf32>
    %51 = vector.extract_strided_slice %48 {offsets = [0, 2], sizes = [2, 1], strides = [1, 1]} : vector<2x4xf32> to vector<2x1xf32>
    %cst_5 = arith.constant 2.000000e+00 : f32
    %52 = vector.broadcast %cst_5 : f32 to vector<2x1xf32>
    %53 = arith.mulf %52, %51 : vector<2x1xf32>
    %cst_6 = arith.constant 1.000000e+00 : f32
    %54 = vector.broadcast %cst_6 : f32 to vector<2x1xf32>
    %55 = arith.subf %53, %54 : vector<2x1xf32>
    %56 = vector.extract_strided_slice %48 {offsets = [0, 3], sizes = [2, 1], strides = [1, 1]} : vector<2x4xf32> to vector<2x1xf32>
    %57 = arith.mulf %50, %8 : vector<2x1xf32>
    %58 = arith.mulf %49, %55 : vector<2x1xf32>
    %59 = arith.addf %57, %58 : vector<2x1xf32>
    %60 = math.tanh %59 : vector<2x1xf32>
    %61 = arith.mulf %56, %60 : vector<2x1xf32>
    %62 = vector.broadcast %61 : vector<2x1xf32> to vector<2x4xf32>
    %63 = vector.broadcast %4 : vector<1x4xf32> to vector<2x4xf32>
    %64 = arith.mulf %62, %63 : vector<2x4xf32>
    %65 = vector.broadcast %3 : vector<1x4xf32> to vector<2x4xf32>
    %66 = arith.addf %65, %64 : vector<2x4xf32>
    %67 = vector.extract_strided_slice %0 {offsets = [0, 5], sizes = [2, 1], strides = [1, 1]} : vector<2x40xf32> to vector<2x1xf32>
    %68 = vector.extract_strided_slice %2 {offsets = [0, 0], sizes = [1, 4], strides = [1, 1]} : vector<5x4xf32> to vector<1x4xf32>
    %69 = vector.broadcast %67 : vector<2x1xf32> to vector<2x4xf32>
    %70 = vector.broadcast %68 : vector<1x4xf32> to vector<2x4xf32>
    %71 = arith.mulf %69, %70 : vector<2x4xf32>
    %72 = arith.addf %66, %71 : vector<2x4xf32>
    %73 = vector.extract_strided_slice %0 {offsets = [0, 6], sizes = [2, 1], strides = [1, 1]} : vector<2x40xf32> to vector<2x1xf32>
    %74 = vector.extract_strided_slice %2 {offsets = [1, 0], sizes = [1, 4], strides = [1, 1]} : vector<5x4xf32> to vector<1x4xf32>
    %75 = vector.broadcast %73 : vector<2x1xf32> to vector<2x4xf32>
    %76 = vector.broadcast %74 : vector<1x4xf32> to vector<2x4xf32>
    %77 = arith.mulf %75, %76 : vector<2x4xf32>
    %78 = arith.addf %72, %77 : vector<2x4xf32>
    %79 = vector.extract_strided_slice %0 {offsets = [0, 7], sizes = [2, 1], strides = [1, 1]} : vector<2x40xf32> to vector<2x1xf32>
    %80 = vector.extract_strided_slice %2 {offsets = [2, 0], sizes = [1, 4], strides = [1, 1]} : vector<5x4xf32> to vector<1x4xf32>
    %81 = vector.broadcast %79 : vector<2x1xf32> to vector<2x4xf32>
    %82 = vector.broadcast %80 : vector<1x4xf32> to vector<2x4xf32>
    %83 = arith.mulf %81, %82 : vector<2x4xf32>
    %84 = arith.addf %78, %83 : vector<2x4xf32>
    %85 = vector.extract_strided_slice %0 {offsets = [0, 8], sizes = [2, 1], strides = [1, 1]} : vector<2x40xf32> to vector<2x1xf32>
    %86 = vector.extract_strided_slice %2 {offsets = [3, 0], sizes = [1, 4], strides = [1, 1]} : vector<5x4xf32> to vector<1x4xf32>
    %87 = vector.broadcast %85 : vector<2x1xf32> to vector<2x4xf32>
    %88 = vector.broadcast %86 : vector<1x4xf32> to vector<2x4xf32>
    %89 = arith.mulf %87, %88 : vector<2x4xf32>
    %90 = arith.addf %84, %89 : vector<2x4xf32>
    %91 = vector.extract_strided_slice %0 {offsets = [0, 9], sizes = [2, 1], strides = [1, 1]} : vector<2x40xf32> to vector<2x1xf32>
    %92 = vector.extract_strided_slice %2 {offsets = [4, 0], sizes = [1, 4], strides = [1, 1]} : vector<5x4xf32> to vector<1x4xf32>
    %93 = vector.broadcast %91 : vector<2x1xf32> to vector<2x4xf32>
    %94 = vector.broadcast %92 : vector<1x4xf32> to vector<2x4xf32>
    %95 = arith.mulf %93, %94 : vector<2x4xf32>
    %96 = arith.addf %90, %95 : vector<2x4xf32>
    %97 = arith.negf %96 : vector<2x4xf32>
    %98 = math.exp %97 : vector<2x4xf32>
    %cst_7 = arith.constant 1.000000e+00 : f32
    %99 = vector.broadcast %cst_7 : f32 to vector<2x4xf32>
    %100 = arith.addf %99, %98 : vector<2x4xf32>
    %101 = arith.divf %99, %100 : vector<2x4xf32>
    %102 = vector.extract_strided_slice %101 {offsets = [0, 0], sizes = [2, 1], strides = [1, 1]} : vector<2x4xf32> to vector<2x1xf32>
    %103 = vector.extract_strided_slice %101 {offsets = [0, 1], sizes = [2, 1], strides = [1, 1]} : vector<2x4xf32> to vector<2x1xf32>
    %104 = vector.extract_strided_slice %101 {offsets = [0, 2], sizes = [2, 1], strides = [1, 1]} : vector<2x4xf32> to vector<2x1xf32>
    %cst_8 = arith.constant 2.000000e+00 : f32
    %105 = vector.broadcast %cst_8 : f32 to vector<2x1xf32>
    %106 = arith.mulf %105, %104 : vector<2x1xf32>
    %cst_9 = arith.constant 1.000000e+00 : f32
    %107 = vector.broadcast %cst_9 : f32 to vector<2x1xf32>
    %108 = arith.subf %106, %107 : vector<2x1xf32>
    %109 = vector.extract_strided_slice %101 {offsets = [0, 3], sizes = [2, 1], strides = [1, 1]} : vector<2x4xf32> to vector<2x1xf32>
    %110 = arith.mulf %103, %59 : vector<2x1xf32>
    %111 = arith.mulf %102, %108 : vector<2x1xf32>
    %112 = arith.addf %110, %111 : vector<2x1xf32>
    %113 = math.tanh %112 : vector<2x1xf32>
    %114 = arith.mulf %109, %113 : vector<2x1xf32>
    %115 = vector.broadcast %114 : vector<2x1xf32> to vector<2x4xf32>
    %116 = vector.broadcast %4 : vector<1x4xf32> to vector<2x4xf32>
    %117 = arith.mulf %115, %116 : vector<2x4xf32>
    %118 = vector.broadcast %3 : vector<1x4xf32> to vector<2x4xf32>
    %119 = arith.addf %118, %117 : vector<2x4xf32>
    %120 = vector.extract_strided_slice %0 {offsets = [0, 10], sizes = [2, 1], strides = [1, 1]} : vector<2x40xf32> to vector<2x1xf32>
    %121 = vector.extract_strided_slice %2 {offsets = [0, 0], sizes = [1, 4], strides = [1, 1]} : vector<5x4xf32> to vector<1x4xf32>
    %122 = vector.broadcast %120 : vector<2x1xf32> to vector<2x4xf32>
    %123 = vector.broadcast %121 : vector<1x4xf32> to vector<2x4xf32>
    %124 = arith.mulf %122, %123 : vector<2x4xf32>
    %125 = arith.addf %119, %124 : vector<2x4xf32>
    %126 = vector.extract_strided_slice %0 {offsets = [0, 11], sizes = [2, 1], strides = [1, 1]} : vector<2x40xf32> to vector<2x1xf32>
    %127 = vector.extract_strided_slice %2 {offsets = [1, 0], sizes = [1, 4], strides = [1, 1]} : vector<5x4xf32> to vector<1x4xf32>
    %128 = vector.broadcast %126 : vector<2x1xf32> to vector<2x4xf32>
    %129 = vector.broadcast %127 : vector<1x4xf32> to vector<2x4xf32>
    %130 = arith.mulf %128, %129 : vector<2x4xf32>
    %131 = arith.addf %125, %130 : vector<2x4xf32>
    %132 = vector.extract_strided_slice %0 {offsets = [0, 12], sizes = [2, 1], strides = [1, 1]} : vector<2x40xf32> to vector<2x1xf32>
    %133 = vector.extract_strided_slice %2 {offsets = [2, 0], sizes = [1, 4], strides = [1, 1]} : vector<5x4xf32> to vector<1x4xf32>
    %134 = vector.broadcast %132 : vector<2x1xf32> to vector<2x4xf32>
    %135 = vector.broadcast %133 : vector<1x4xf32> to vector<2x4xf32>
    %136 = arith.mulf %134, %135 : vector<2x4xf32>
    %137 = arith.addf %131, %136 : vector<2x4xf32>
    %138 = vector.extract_strided_slice %0 {offsets = [0, 13], sizes = [2, 1], strides = [1, 1]} : vector<2x40xf32> to vector<2x1xf32>
    %139 = vector.extract_strided_slice %2 {offsets = [3, 0], sizes = [1, 4], strides = [1, 1]} : vector<5x4xf32> to vector<1x4xf32>
    %140 = vector.broadcast %138 : vector<2x1xf32> to vector<2x4xf32>
    %141 = vector.broadcast %139 : vector<1x4xf32> to vector<2x4xf32>
    %142 = arith.mulf %140, %141 : vector<2x4xf32>
    %143 = arith.addf %137, %142 : vector<2x4xf32>
    %144 = vector.extract_strided_slice %0 {offsets = [0, 14], sizes = [2, 1], strides = [1, 1]} : vector<2x40xf32> to vector<2x1xf32>
    %145 = vector.extract_strided_slice %2 {offsets = [4, 0], sizes = [1, 4], strides = [1, 1]} : vector<5x4xf32> to vector<1x4xf32>
    %146 = vector.broadcast %144 : vector<2x1xf32> to vector<2x4xf32>
    %147 = vector.broadcast %145 : vector<1x4xf32> to vector<2x4xf32>
    %148 = arith.mulf %146, %147 : vector<2x4xf32>
    %149 = arith.addf %143, %148 : vector<2x4xf32>
    %150 = arith.negf %149 : vector<2x4xf32>
    %151 = math.exp %150 : vector<2x4xf32>
    %cst_10 = arith.constant 1.000000e+00 : f32
    %152 = vector.broadcast %cst_10 : f32 to vector<2x4xf32>
    %153 = arith.addf %152, %151 : vector<2x4xf32>
    %154 = arith.divf %152, %153 : vector<2x4xf32>
    %155 = vector.extract_strided_slice %154 {offsets = [0, 0], sizes = [2, 1], strides = [1, 1]} : vector<2x4xf32> to vector<2x1xf32>
    %156 = vector.extract_strided_slice %154 {offsets = [0, 1], sizes = [2, 1], strides = [1, 1]} : vector<2x4xf32> to vector<2x1xf32>
    %157 = vector.extract_strided_slice %154 {offsets = [0, 2], sizes = [2, 1], strides = [1, 1]} : vector<2x4xf32> to vector<2x1xf32>
    %cst_11 = arith.constant 2.000000e+00 : f32
    %158 = vector.broadcast %cst_11 : f32 to vector<2x1xf32>
    %159 = arith.mulf %158, %157 : vector<2x1xf32>
    %cst_12 = arith.constant 1.000000e+00 : f32
    %160 = vector.broadcast %cst_12 : f32 to vector<2x1xf32>
    %161 = arith.subf %159, %160 : vector<2x1xf32>
    %162 = vector.extract_strided_slice %154 {offsets = [0, 3], sizes = [2, 1], strides = [1, 1]} : vector<2x4xf32> to vector<2x1xf32>
    %163 = arith.mulf %156, %112 : vector<2x1xf32>
    %164 = arith.mulf %155, %161 : vector<2x1xf32>
    %165 = arith.addf %163, %164 : vector<2x1xf32>
    %166 = math.tanh %165 : vector<2x1xf32>
    %167 = arith.mulf %162, %166 : vector<2x1xf32>
    %168 = vector.broadcast %167 : vector<2x1xf32> to vector<2x4xf32>
    %169 = vector.broadcast %4 : vector<1x4xf32> to vector<2x4xf32>
    %170 = arith.mulf %168, %169 : vector<2x4xf32>
    %171 = vector.broadcast %3 : vector<1x4xf32> to vector<2x4xf32>
    %172 = arith.addf %171, %170 : vector<2x4xf32>
    %173 = vector.extract_strided_slice %0 {offsets = [0, 15], sizes = [2, 1], strides = [1, 1]} : vector<2x40xf32> to vector<2x1xf32>
    %174 = vector.extract_strided_slice %2 {offsets = [0, 0], sizes = [1, 4], strides = [1, 1]} : vector<5x4xf32> to vector<1x4xf32>
    %175 = vector.broadcast %173 : vector<2x1xf32> to vector<2x4xf32>
    %176 = vector.broadcast %174 : vector<1x4xf32> to vector<2x4xf32>
    %177 = arith.mulf %175, %176 : vector<2x4xf32>
    %178 = arith.addf %172, %177 : vector<2x4xf32>
    %179 = vector.extract_strided_slice %0 {offsets = [0, 16], sizes = [2, 1], strides = [1, 1]} : vector<2x40xf32> to vector<2x1xf32>
    %180 = vector.extract_strided_slice %2 {offsets = [1, 0], sizes = [1, 4], strides = [1, 1]} : vector<5x4xf32> to vector<1x4xf32>
    %181 = vector.broadcast %179 : vector<2x1xf32> to vector<2x4xf32>
    %182 = vector.broadcast %180 : vector<1x4xf32> to vector<2x4xf32>
    %183 = arith.mulf %181, %182 : vector<2x4xf32>
    %184 = arith.addf %178, %183 : vector<2x4xf32>
    %185 = vector.extract_strided_slice %0 {offsets = [0, 17], sizes = [2, 1], strides = [1, 1]} : vector<2x40xf32> to vector<2x1xf32>
    %186 = vector.extract_strided_slice %2 {offsets = [2, 0], sizes = [1, 4], strides = [1, 1]} : vector<5x4xf32> to vector<1x4xf32>
    %187 = vector.broadcast %185 : vector<2x1xf32> to vector<2x4xf32>
    %188 = vector.broadcast %186 : vector<1x4xf32> to vector<2x4xf32>
    %189 = arith.mulf %187, %188 : vector<2x4xf32>
    %190 = arith.addf %184, %189 : vector<2x4xf32>
    %191 = vector.extract_strided_slice %0 {offsets = [0, 18], sizes = [2, 1], strides = [1, 1]} : vector<2x40xf32> to vector<2x1xf32>
    %192 = vector.extract_strided_slice %2 {offsets = [3, 0], sizes = [1, 4], strides = [1, 1]} : vector<5x4xf32> to vector<1x4xf32>
    %193 = vector.broadcast %191 : vector<2x1xf32> to vector<2x4xf32>
    %194 = vector.broadcast %192 : vector<1x4xf32> to vector<2x4xf32>
    %195 = arith.mulf %193, %194 : vector<2x4xf32>
    %196 = arith.addf %190, %195 : vector<2x4xf32>
    %197 = vector.extract_strided_slice %0 {offsets = [0, 19], sizes = [2, 1], strides = [1, 1]} : vector<2x40xf32> to vector<2x1xf32>
    %198 = vector.extract_strided_slice %2 {offsets = [4, 0], sizes = [1, 4], strides = [1, 1]} : vector<5x4xf32> to vector<1x4xf32>
    %199 = vector.broadcast %197 : vector<2x1xf32> to vector<2x4xf32>
    %200 = vector.broadcast %198 : vector<1x4xf32> to vector<2x4xf32>
    %201 = arith.mulf %199, %200 : vector<2x4xf32>
    %202 = arith.addf %196, %201 : vector<2x4xf32>
    %203 = arith.negf %202 : vector<2x4xf32>
    %204 = math.exp %203 : vector<2x4xf32>
    %cst_13 = arith.constant 1.000000e+00 : f32
    %205 = vector.broadcast %cst_13 : f32 to vector<2x4xf32>
    %206 = arith.addf %205, %204 : vector<2x4xf32>
    %207 = arith.divf %205, %206 : vector<2x4xf32>
    %208 = vector.extract_strided_slice %207 {offsets = [0, 0], sizes = [2, 1], strides = [1, 1]} : vector<2x4xf32> to vector<2x1xf32>
    %209 = vector.extract_strided_slice %207 {offsets = [0, 1], sizes = [2, 1], strides = [1, 1]} : vector<2x4xf32> to vector<2x1xf32>
    %210 = vector.extract_strided_slice %207 {offsets = [0, 2], sizes = [2, 1], strides = [1, 1]} : vector<2x4xf32> to vector<2x1xf32>
    %cst_14 = arith.constant 2.000000e+00 : f32
    %211 = vector.broadcast %cst_14 : f32 to vector<2x1xf32>
    %212 = arith.mulf %211, %210 : vector<2x1xf32>
    %cst_15 = arith.constant 1.000000e+00 : f32
    %213 = vector.broadcast %cst_15 : f32 to vector<2x1xf32>
    %214 = arith.subf %212, %213 : vector<2x1xf32>
    %215 = vector.extract_strided_slice %207 {offsets = [0, 3], sizes = [2, 1], strides = [1, 1]} : vector<2x4xf32> to vector<2x1xf32>
    %216 = arith.mulf %209, %165 : vector<2x1xf32>
    %217 = arith.mulf %208, %214 : vector<2x1xf32>
    %218 = arith.addf %216, %217 : vector<2x1xf32>
    %219 = math.tanh %218 : vector<2x1xf32>
    %220 = arith.mulf %215, %219 : vector<2x1xf32>
    %221 = vector.broadcast %220 : vector<2x1xf32> to vector<2x4xf32>
    %222 = vector.broadcast %4 : vector<1x4xf32> to vector<2x4xf32>
    %223 = arith.mulf %221, %222 : vector<2x4xf32>
    %224 = vector.broadcast %3 : vector<1x4xf32> to vector<2x4xf32>
    %225 = arith.addf %224, %223 : vector<2x4xf32>
    %226 = vector.extract_strided_slice %0 {offsets = [0, 20], sizes = [2, 1], strides = [1, 1]} : vector<2x40xf32> to vector<2x1xf32>
    %227 = vector.extract_strided_slice %2 {offsets = [0, 0], sizes = [1, 4], strides = [1, 1]} : vector<5x4xf32> to vector<1x4xf32>
    %228 = vector.broadcast %226 : vector<2x1xf32> to vector<2x4xf32>
    %229 = vector.broadcast %227 : vector<1x4xf32> to vector<2x4xf32>
    %230 = arith.mulf %228, %229 : vector<2x4xf32>
    %231 = arith.addf %225, %230 : vector<2x4xf32>
    %232 = vector.extract_strided_slice %0 {offsets = [0, 21], sizes = [2, 1], strides = [1, 1]} : vector<2x40xf32> to vector<2x1xf32>
    %233 = vector.extract_strided_slice %2 {offsets = [1, 0], sizes = [1, 4], strides = [1, 1]} : vector<5x4xf32> to vector<1x4xf32>
    %234 = vector.broadcast %232 : vector<2x1xf32> to vector<2x4xf32>
    %235 = vector.broadcast %233 : vector<1x4xf32> to vector<2x4xf32>
    %236 = arith.mulf %234, %235 : vector<2x4xf32>
    %237 = arith.addf %231, %236 : vector<2x4xf32>
    %238 = vector.extract_strided_slice %0 {offsets = [0, 22], sizes = [2, 1], strides = [1, 1]} : vector<2x40xf32> to vector<2x1xf32>
    %239 = vector.extract_strided_slice %2 {offsets = [2, 0], sizes = [1, 4], strides = [1, 1]} : vector<5x4xf32> to vector<1x4xf32>
    %240 = vector.broadcast %238 : vector<2x1xf32> to vector<2x4xf32>
    %241 = vector.broadcast %239 : vector<1x4xf32> to vector<2x4xf32>
    %242 = arith.mulf %240, %241 : vector<2x4xf32>
    %243 = arith.addf %237, %242 : vector<2x4xf32>
    %244 = vector.extract_strided_slice %0 {offsets = [0, 23], sizes = [2, 1], strides = [1, 1]} : vector<2x40xf32> to vector<2x1xf32>
    %245 = vector.extract_strided_slice %2 {offsets = [3, 0], sizes = [1, 4], strides = [1, 1]} : vector<5x4xf32> to vector<1x4xf32>
    %246 = vector.broadcast %244 : vector<2x1xf32> to vector<2x4xf32>
    %247 = vector.broadcast %245 : vector<1x4xf32> to vector<2x4xf32>
    %248 = arith.mulf %246, %247 : vector<2x4xf32>
    %249 = arith.addf %243, %248 : vector<2x4xf32>
    %250 = vector.extract_strided_slice %0 {offsets = [0, 24], sizes = [2, 1], strides = [1, 1]} : vector<2x40xf32> to vector<2x1xf32>
    %251 = vector.extract_strided_slice %2 {offsets = [4, 0], sizes = [1, 4], strides = [1, 1]} : vector<5x4xf32> to vector<1x4xf32>
    %252 = vector.broadcast %250 : vector<2x1xf32> to vector<2x4xf32>
    %253 = vector.broadcast %251 : vector<1x4xf32> to vector<2x4xf32>
    %254 = arith.mulf %252, %253 : vector<2x4xf32>
    %255 = arith.addf %249, %254 : vector<2x4xf32>
    %256 = arith.negf %255 : vector<2x4xf32>
    %257 = math.exp %256 : vector<2x4xf32>
    %cst_16 = arith.constant 1.000000e+00 : f32
    %258 = vector.broadcast %cst_16 : f32 to vector<2x4xf32>
    %259 = arith.addf %258, %257 : vector<2x4xf32>
    %260 = arith.divf %258, %259 : vector<2x4xf32>
    %261 = vector.extract_strided_slice %260 {offsets = [0, 0], sizes = [2, 1], strides = [1, 1]} : vector<2x4xf32> to vector<2x1xf32>
    %262 = vector.extract_strided_slice %260 {offsets = [0, 1], sizes = [2, 1], strides = [1, 1]} : vector<2x4xf32> to vector<2x1xf32>
    %263 = vector.extract_strided_slice %260 {offsets = [0, 2], sizes = [2, 1], strides = [1, 1]} : vector<2x4xf32> to vector<2x1xf32>
    %cst_17 = arith.constant 2.000000e+00 : f32
    %264 = vector.broadcast %cst_17 : f32 to vector<2x1xf32>
    %265 = arith.mulf %264, %263 : vector<2x1xf32>
    %cst_18 = arith.constant 1.000000e+00 : f32
    %266 = vector.broadcast %cst_18 : f32 to vector<2x1xf32>
    %267 = arith.subf %265, %266 : vector<2x1xf32>
    %268 = vector.extract_strided_slice %260 {offsets = [0, 3], sizes = [2, 1], strides = [1, 1]} : vector<2x4xf32> to vector<2x1xf32>
    %269 = arith.mulf %262, %218 : vector<2x1xf32>
    %270 = arith.mulf %261, %267 : vector<2x1xf32>
    %271 = arith.addf %269, %270 : vector<2x1xf32>
    %272 = math.tanh %271 : vector<2x1xf32>
    %273 = arith.mulf %268, %272 : vector<2x1xf32>
    %274 = vector.broadcast %273 : vector<2x1xf32> to vector<2x4xf32>
    %275 = vector.broadcast %4 : vector<1x4xf32> to vector<2x4xf32>
    %276 = arith.mulf %274, %275 : vector<2x4xf32>
    %277 = vector.broadcast %3 : vector<1x4xf32> to vector<2x4xf32>
    %278 = arith.addf %277, %276 : vector<2x4xf32>
    %279 = vector.extract_strided_slice %0 {offsets = [0, 25], sizes = [2, 1], strides = [1, 1]} : vector<2x40xf32> to vector<2x1xf32>
    %280 = vector.extract_strided_slice %2 {offsets = [0, 0], sizes = [1, 4], strides = [1, 1]} : vector<5x4xf32> to vector<1x4xf32>
    %281 = vector.broadcast %279 : vector<2x1xf32> to vector<2x4xf32>
    %282 = vector.broadcast %280 : vector<1x4xf32> to vector<2x4xf32>
    %283 = arith.mulf %281, %282 : vector<2x4xf32>
    %284 = arith.addf %278, %283 : vector<2x4xf32>
    %285 = vector.extract_strided_slice %0 {offsets = [0, 26], sizes = [2, 1], strides = [1, 1]} : vector<2x40xf32> to vector<2x1xf32>
    %286 = vector.extract_strided_slice %2 {offsets = [1, 0], sizes = [1, 4], strides = [1, 1]} : vector<5x4xf32> to vector<1x4xf32>
    %287 = vector.broadcast %285 : vector<2x1xf32> to vector<2x4xf32>
    %288 = vector.broadcast %286 : vector<1x4xf32> to vector<2x4xf32>
    %289 = arith.mulf %287, %288 : vector<2x4xf32>
    %290 = arith.addf %284, %289 : vector<2x4xf32>
    %291 = vector.extract_strided_slice %0 {offsets = [0, 27], sizes = [2, 1], strides = [1, 1]} : vector<2x40xf32> to vector<2x1xf32>
    %292 = vector.extract_strided_slice %2 {offsets = [2, 0], sizes = [1, 4], strides = [1, 1]} : vector<5x4xf32> to vector<1x4xf32>
    %293 = vector.broadcast %291 : vector<2x1xf32> to vector<2x4xf32>
    %294 = vector.broadcast %292 : vector<1x4xf32> to vector<2x4xf32>
    %295 = arith.mulf %293, %294 : vector<2x4xf32>
    %296 = arith.addf %290, %295 : vector<2x4xf32>
    %297 = vector.extract_strided_slice %0 {offsets = [0, 28], sizes = [2, 1], strides = [1, 1]} : vector<2x40xf32> to vector<2x1xf32>
    %298 = vector.extract_strided_slice %2 {offsets = [3, 0], sizes = [1, 4], strides = [1, 1]} : vector<5x4xf32> to vector<1x4xf32>
    %299 = vector.broadcast %297 : vector<2x1xf32> to vector<2x4xf32>
    %300 = vector.broadcast %298 : vector<1x4xf32> to vector<2x4xf32>
    %301 = arith.mulf %299, %300 : vector<2x4xf32>
    %302 = arith.addf %296, %301 : vector<2x4xf32>
    %303 = vector.extract_strided_slice %0 {offsets = [0, 29], sizes = [2, 1], strides = [1, 1]} : vector<2x40xf32> to vector<2x1xf32>
    %304 = vector.extract_strided_slice %2 {offsets = [4, 0], sizes = [1, 4], strides = [1, 1]} : vector<5x4xf32> to vector<1x4xf32>
    %305 = vector.broadcast %303 : vector<2x1xf32> to vector<2x4xf32>
    %306 = vector.broadcast %304 : vector<1x4xf32> to vector<2x4xf32>
    %307 = arith.mulf %305, %306 : vector<2x4xf32>
    %308 = arith.addf %302, %307 : vector<2x4xf32>
    %309 = arith.negf %308 : vector<2x4xf32>
    %310 = math.exp %309 : vector<2x4xf32>
    %cst_19 = arith.constant 1.000000e+00 : f32
    %311 = vector.broadcast %cst_19 : f32 to vector<2x4xf32>
    %312 = arith.addf %311, %310 : vector<2x4xf32>
    %313 = arith.divf %311, %312 : vector<2x4xf32>
    %314 = vector.extract_strided_slice %313 {offsets = [0, 0], sizes = [2, 1], strides = [1, 1]} : vector<2x4xf32> to vector<2x1xf32>
    %315 = vector.extract_strided_slice %313 {offsets = [0, 1], sizes = [2, 1], strides = [1, 1]} : vector<2x4xf32> to vector<2x1xf32>
    %316 = vector.extract_strided_slice %313 {offsets = [0, 2], sizes = [2, 1], strides = [1, 1]} : vector<2x4xf32> to vector<2x1xf32>
    %cst_20 = arith.constant 2.000000e+00 : f32
    %317 = vector.broadcast %cst_20 : f32 to vector<2x1xf32>
    %318 = arith.mulf %317, %316 : vector<2x1xf32>
    %cst_21 = arith.constant 1.000000e+00 : f32
    %319 = vector.broadcast %cst_21 : f32 to vector<2x1xf32>
    %320 = arith.subf %318, %319 : vector<2x1xf32>
    %321 = vector.extract_strided_slice %313 {offsets = [0, 3], sizes = [2, 1], strides = [1, 1]} : vector<2x4xf32> to vector<2x1xf32>
    %322 = arith.mulf %315, %271 : vector<2x1xf32>
    %323 = arith.mulf %314, %320 : vector<2x1xf32>
    %324 = arith.addf %322, %323 : vector<2x1xf32>
    %325 = math.tanh %324 : vector<2x1xf32>
    %326 = arith.mulf %321, %325 : vector<2x1xf32>
    %327 = vector.broadcast %326 : vector<2x1xf32> to vector<2x4xf32>
    %328 = vector.broadcast %4 : vector<1x4xf32> to vector<2x4xf32>
    %329 = arith.mulf %327, %328 : vector<2x4xf32>
    %330 = vector.broadcast %3 : vector<1x4xf32> to vector<2x4xf32>
    %331 = arith.addf %330, %329 : vector<2x4xf32>
    %332 = vector.extract_strided_slice %0 {offsets = [0, 30], sizes = [2, 1], strides = [1, 1]} : vector<2x40xf32> to vector<2x1xf32>
    %333 = vector.extract_strided_slice %2 {offsets = [0, 0], sizes = [1, 4], strides = [1, 1]} : vector<5x4xf32> to vector<1x4xf32>
    %334 = vector.broadcast %332 : vector<2x1xf32> to vector<2x4xf32>
    %335 = vector.broadcast %333 : vector<1x4xf32> to vector<2x4xf32>
    %336 = arith.mulf %334, %335 : vector<2x4xf32>
    %337 = arith.addf %331, %336 : vector<2x4xf32>
    %338 = vector.extract_strided_slice %0 {offsets = [0, 31], sizes = [2, 1], strides = [1, 1]} : vector<2x40xf32> to vector<2x1xf32>
    %339 = vector.extract_strided_slice %2 {offsets = [1, 0], sizes = [1, 4], strides = [1, 1]} : vector<5x4xf32> to vector<1x4xf32>
    %340 = vector.broadcast %338 : vector<2x1xf32> to vector<2x4xf32>
    %341 = vector.broadcast %339 : vector<1x4xf32> to vector<2x4xf32>
    %342 = arith.mulf %340, %341 : vector<2x4xf32>
    %343 = arith.addf %337, %342 : vector<2x4xf32>
    %344 = vector.extract_strided_slice %0 {offsets = [0, 32], sizes = [2, 1], strides = [1, 1]} : vector<2x40xf32> to vector<2x1xf32>
    %345 = vector.extract_strided_slice %2 {offsets = [2, 0], sizes = [1, 4], strides = [1, 1]} : vector<5x4xf32> to vector<1x4xf32>
    %346 = vector.broadcast %344 : vector<2x1xf32> to vector<2x4xf32>
    %347 = vector.broadcast %345 : vector<1x4xf32> to vector<2x4xf32>
    %348 = arith.mulf %346, %347 : vector<2x4xf32>
    %349 = arith.addf %343, %348 : vector<2x4xf32>
    %350 = vector.extract_strided_slice %0 {offsets = [0, 33], sizes = [2, 1], strides = [1, 1]} : vector<2x40xf32> to vector<2x1xf32>
    %351 = vector.extract_strided_slice %2 {offsets = [3, 0], sizes = [1, 4], strides = [1, 1]} : vector<5x4xf32> to vector<1x4xf32>
    %352 = vector.broadcast %350 : vector<2x1xf32> to vector<2x4xf32>
    %353 = vector.broadcast %351 : vector<1x4xf32> to vector<2x4xf32>
    %354 = arith.mulf %352, %353 : vector<2x4xf32>
    %355 = arith.addf %349, %354 : vector<2x4xf32>
    %356 = vector.extract_strided_slice %0 {offsets = [0, 34], sizes = [2, 1], strides = [1, 1]} : vector<2x40xf32> to vector<2x1xf32>
    %357 = vector.extract_strided_slice %2 {offsets = [4, 0], sizes = [1, 4], strides = [1, 1]} : vector<5x4xf32> to vector<1x4xf32>
    %358 = vector.broadcast %356 : vector<2x1xf32> to vector<2x4xf32>
    %359 = vector.broadcast %357 : vector<1x4xf32> to vector<2x4xf32>
    %360 = arith.mulf %358, %359 : vector<2x4xf32>
    %361 = arith.addf %355, %360 : vector<2x4xf32>
    %362 = arith.negf %361 : vector<2x4xf32>
    %363 = math.exp %362 : vector<2x4xf32>
    %cst_22 = arith.constant 1.000000e+00 : f32
    %364 = vector.broadcast %cst_22 : f32 to vector<2x4xf32>
    %365 = arith.addf %364, %363 : vector<2x4xf32>
    %366 = arith.divf %364, %365 : vector<2x4xf32>
    %367 = vector.extract_strided_slice %366 {offsets = [0, 0], sizes = [2, 1], strides = [1, 1]} : vector<2x4xf32> to vector<2x1xf32>
    %368 = vector.extract_strided_slice %366 {offsets = [0, 1], sizes = [2, 1], strides = [1, 1]} : vector<2x4xf32> to vector<2x1xf32>
    %369 = vector.extract_strided_slice %366 {offsets = [0, 2], sizes = [2, 1], strides = [1, 1]} : vector<2x4xf32> to vector<2x1xf32>
    %cst_23 = arith.constant 2.000000e+00 : f32
    %370 = vector.broadcast %cst_23 : f32 to vector<2x1xf32>
    %371 = arith.mulf %370, %369 : vector<2x1xf32>
    %cst_24 = arith.constant 1.000000e+00 : f32
    %372 = vector.broadcast %cst_24 : f32 to vector<2x1xf32>
    %373 = arith.subf %371, %372 : vector<2x1xf32>
    %374 = vector.extract_strided_slice %366 {offsets = [0, 3], sizes = [2, 1], strides = [1, 1]} : vector<2x4xf32> to vector<2x1xf32>
    %375 = arith.mulf %368, %324 : vector<2x1xf32>
    %376 = arith.mulf %367, %373 : vector<2x1xf32>
    %377 = arith.addf %375, %376 : vector<2x1xf32>
    %378 = math.tanh %377 : vector<2x1xf32>
    %379 = arith.mulf %374, %378 : vector<2x1xf32>
    %380 = vector.broadcast %379 : vector<2x1xf32> to vector<2x4xf32>
    %381 = vector.broadcast %4 : vector<1x4xf32> to vector<2x4xf32>
    %382 = arith.mulf %380, %381 : vector<2x4xf32>
    %383 = vector.broadcast %3 : vector<1x4xf32> to vector<2x4xf32>
    %384 = arith.addf %383, %382 : vector<2x4xf32>
    %385 = vector.extract_strided_slice %0 {offsets = [0, 35], sizes = [2, 1], strides = [1, 1]} : vector<2x40xf32> to vector<2x1xf32>
    %386 = vector.extract_strided_slice %2 {offsets = [0, 0], sizes = [1, 4], strides = [1, 1]} : vector<5x4xf32> to vector<1x4xf32>
    %387 = vector.broadcast %385 : vector<2x1xf32> to vector<2x4xf32>
    %388 = vector.broadcast %386 : vector<1x4xf32> to vector<2x4xf32>
    %389 = arith.mulf %387, %388 : vector<2x4xf32>
    %390 = arith.addf %384, %389 : vector<2x4xf32>
    %391 = vector.extract_strided_slice %0 {offsets = [0, 36], sizes = [2, 1], strides = [1, 1]} : vector<2x40xf32> to vector<2x1xf32>
    %392 = vector.extract_strided_slice %2 {offsets = [1, 0], sizes = [1, 4], strides = [1, 1]} : vector<5x4xf32> to vector<1x4xf32>
    %393 = vector.broadcast %391 : vector<2x1xf32> to vector<2x4xf32>
    %394 = vector.broadcast %392 : vector<1x4xf32> to vector<2x4xf32>
    %395 = arith.mulf %393, %394 : vector<2x4xf32>
    %396 = arith.addf %390, %395 : vector<2x4xf32>
    %397 = vector.extract_strided_slice %0 {offsets = [0, 37], sizes = [2, 1], strides = [1, 1]} : vector<2x40xf32> to vector<2x1xf32>
    %398 = vector.extract_strided_slice %2 {offsets = [2, 0], sizes = [1, 4], strides = [1, 1]} : vector<5x4xf32> to vector<1x4xf32>
    %399 = vector.broadcast %397 : vector<2x1xf32> to vector<2x4xf32>
    %400 = vector.broadcast %398 : vector<1x4xf32> to vector<2x4xf32>
    %401 = arith.mulf %399, %400 : vector<2x4xf32>
    %402 = arith.addf %396, %401 : vector<2x4xf32>
    %403 = vector.extract_strided_slice %0 {offsets = [0, 38], sizes = [2, 1], strides = [1, 1]} : vector<2x40xf32> to vector<2x1xf32>
    %404 = vector.extract_strided_slice %2 {offsets = [3, 0], sizes = [1, 4], strides = [1, 1]} : vector<5x4xf32> to vector<1x4xf32>
    %405 = vector.broadcast %403 : vector<2x1xf32> to vector<2x4xf32>
    %406 = vector.broadcast %404 : vector<1x4xf32> to vector<2x4xf32>
    %407 = arith.mulf %405, %406 : vector<2x4xf32>
    %408 = arith.addf %402, %407 : vector<2x4xf32>
    %409 = vector.extract_strided_slice %0 {offsets = [0, 39], sizes = [2, 1], strides = [1, 1]} : vector<2x40xf32> to vector<2x1xf32>
    %410 = vector.extract_strided_slice %2 {offsets = [4, 0], sizes = [1, 4], strides = [1, 1]} : vector<5x4xf32> to vector<1x4xf32>
    %411 = vector.broadcast %409 : vector<2x1xf32> to vector<2x4xf32>
    %412 = vector.broadcast %410 : vector<1x4xf32> to vector<2x4xf32>
    %413 = arith.mulf %411, %412 : vector<2x4xf32>
    %414 = arith.addf %408, %413 : vector<2x4xf32>
    %415 = arith.negf %414 : vector<2x4xf32>
    %416 = math.exp %415 : vector<2x4xf32>
    %cst_25 = arith.constant 1.000000e+00 : f32
    %417 = vector.broadcast %cst_25 : f32 to vector<2x4xf32>
    %418 = arith.addf %417, %416 : vector<2x4xf32>
    %419 = arith.divf %417, %418 : vector<2x4xf32>
    %420 = vector.extract_strided_slice %419 {offsets = [0, 0], sizes = [2, 1], strides = [1, 1]} : vector<2x4xf32> to vector<2x1xf32>
    %421 = vector.extract_strided_slice %419 {offsets = [0, 1], sizes = [2, 1], strides = [1, 1]} : vector<2x4xf32> to vector<2x1xf32>
    %422 = vector.extract_strided_slice %419 {offsets = [0, 2], sizes = [2, 1], strides = [1, 1]} : vector<2x4xf32> to vector<2x1xf32>
    %cst_26 = arith.constant 2.000000e+00 : f32
    %423 = vector.broadcast %cst_26 : f32 to vector<2x1xf32>
    %424 = arith.mulf %423, %422 : vector<2x1xf32>
    %cst_27 = arith.constant 1.000000e+00 : f32
    %425 = vector.broadcast %cst_27 : f32 to vector<2x1xf32>
    %426 = arith.subf %424, %425 : vector<2x1xf32>
    %427 = vector.extract_strided_slice %419 {offsets = [0, 3], sizes = [2, 1], strides = [1, 1]} : vector<2x4xf32> to vector<2x1xf32>
    %428 = arith.mulf %421, %377 : vector<2x1xf32>
    %429 = arith.mulf %420, %426 : vector<2x1xf32>
    %430 = arith.addf %428, %429 : vector<2x1xf32>
    %431 = math.tanh %430 : vector<2x1xf32>
    %432 = arith.mulf %427, %431 : vector<2x1xf32>
    %433 = vector.broadcast %5 : vector<1x1xf32> to vector<2x1xf32>
    %434 = arith.mulf %432, %433 : vector<2x1xf32>
    %435 = vector.broadcast %6 : vector<1x1xf32> to vector<2x1xf32>
    %436 = arith.addf %434, %435 : vector<2x1xf32>
    %437 = tpu.iota {dimensions = array<i32: 1>} : vector<2x3xi32>
    %c0_i32 = arith.constant 0 : i32
    %438 = vector.broadcast %c0_i32 : i32 to vector<2x3xi32>
    %439 = arith.cmpi eq, %437, %438 : vector<2x3xi32>
    %c1_i32 = arith.constant 1 : i32
    %440 = vector.broadcast %c1_i32 : i32 to vector<2x3xi32>
    %441 = arith.cmpi eq, %437, %440 : vector<2x3xi32>
    %442 = vector.shape_cast %432 : vector<2x1xf32> to vector<2x1xf32>
    %443 = vector.broadcast %442 : vector<2x1xf32> to vector<2x3xf32>
    %444 = vector.shape_cast %430 : vector<2x1xf32> to vector<2x1xf32>
    %445 = vector.broadcast %444 : vector<2x1xf32> to vector<2x3xf32>
    %446 = arith.select %441, %443, %445 : vector<2x3xi1>, vector<2x3xf32>
    %447 = vector.shape_cast %436 : vector<2x1xf32> to vector<2x1xf32>
    %448 = vector.broadcast %447 : vector<2x1xf32> to vector<2x3xf32>
    %449 = arith.select %439, %448, %446 : vector<2x3xi1>, vector<2x3xf32>
    %c0_28 = arith.constant 0 : index
    %c0_29 = arith.constant 0 : index
    %450 = vector.load %arg2[%c0_28, %c0_29] : memref<2x3xf32, #tpu.memory_space<vmem>>, vector<2x3xf32>
    tpu.vector_store %arg2[%c0_28, %c0_29], %449 {strides = array<i32>} : memref<2x3xf32, #tpu.memory_space<vmem>>, vector<2x3xf32>,
    return
  }
}

</mosaic_0001>

<bundles_post_ra>
// kernel: lstm_model_forward.1
= control target key start
LH: loop header
LB: loop body
LE: loop exit
PB: predicated region body
PF: predicated region fallthrough
CT: control target
= control target key end

     0   :  { %v731_v0 = vmov 0   ;;  %v732_v1 = vmov 2   ;;  %v733_v3 = vmov 1   ;;  %v734_v4 = vmov 3   ;;  %s737_s12 = smov 1   ;;  %s739_s13 = smov 2   ;;  %s970_s0 = inlined_call_operand.vmem [shape: f32[2,40], index: 0, kind: input, shape index: {}]   ;;  %s971_s1 = inlined_call_operand.vmem [shape: f32[8,4], index: 1, kind: input, shape index: {}]   ;;  %s972_s2 = inlined_call_operand.vmem [shape: f32[2,3], index: 2, kind: output, shape index: {}]  }
   0x1   :  { %633 = vset.pattern.permute.xlu0 %v731_v0  ;;  %635 = vset.pattern.permute.xlu1 %v732_v1  ;;  %v793_v2 = vld [vmem:[%s970_s0] sm:$0x3]  ;;  %v735_v5 = vmov 4   ;;  %v13_v6 = vlaneseq  ;;  %v738_v51 = vmov 5   ;;  %v740_v53 = vmov 8   ;;  %s774_s14 = smov 3  }
   0x2   :  { %25 = vperm.xlu0 %633, %v793_v2   ;;  %45 = vperm.xlu1 %635, %v793_v2   ;;  %v810_v9 = vld [vmem:[%s971_s1] sm:$0xff]  ;;  %s736_s1 = smov 126   ;;  %v741_v56 = vmov 6   ;;  %v742_v57 = vmov 7   ;;  %v743_v58 = vmov 9   ;;  %vm567_vm2 = vcmask 17408  }
   0x3   :  { %v804_v7 = vshrl.u32 %v13_v6, 7 }
   0x5   :  { %v15_v8 = vsub.s32 6, %v804_v7  ;;  %v20_v11 = vsub.s32 5, %v804_v7  ;;  %v30_v12 = vsub.s32 0, %v804_v7  ;;  %v40_v16 = vsub.s32 1, %v804_v7 }
   0x6   :  { %634 = vset.pattern.permute.xlu0 %v733_v3  ;;  %636 = vset.pattern.permute.xlu1 %v734_v4  ;;  %v50_v18 = vsub.s32 2, %v804_v7  ;;  %v60_v23 = vsub.s32 3, %v804_v7  ;;  %v70_v24 = vsub.s32 4, %v804_v7 }
   0x7   :  { %35 = vperm.xlu0 %634, %v793_v2   ;;  %55 = vperm.xlu1 %636, %v793_v2   ;;  %v813_v10 = vrot.slane %v810_v9, %v15_v8  ;;  %v819_v14 = vrot.slane %v810_v9, %v20_v11  ;;  %v822_v15 = vrot.slane %v810_v9, %v30_v12 }
   0x8   :  { %v829_v22 = vrot.slane %v810_v9, %v40_v16  ;;  %v834_v25 = vrot.slane %v810_v9, %v50_v18  ;;  %v838_v30 = vrot.slane %v810_v9, %v60_v23  ;;  %v841_v31 = vrot.slane %v810_v9, %v70_v24 }
   0x9   :  { %v17_v13 = vmul.f32 0.0, %v813_v10 }
   0xb   :  { %637 = vset.pattern.permute.xlu1 %v735_v5  ;;  %v22_v20 = vadd.f32 %v819_v14, %v17_v13  ;;  %638 = vset.pattern.permute.xlu0 %v738_v51 }
   0xc   :  { %65 = vperm.xlu1 %637, %v793_v2  }
  0x10   :  { %639 = vset.pattern.permute.xlu1 %v734_v4 }
  0x81   :  { %v26_v17 = vpop.permute.xlu0 %25  ;;  %v46_v19 = vpop.permute.xlu1 %45 }
  0x82   :  { %v32_v21 = vmul.f32 %v822_v15, %v26_v17  ;;  %v52_v32 = vmul.f32 %v834_v25, %v46_v19 }
  0x84   :  { %v33_v28 = vadd.f32 %v32_v21, %v22_v20 }
  0x86   :  { %v36_v26 = vpop.permute.xlu0 %35  ;;  %v56_v27 = vpop.permute.xlu1 %55 }
  0x87   :  { %v42_v29 = vmul.f32 %v829_v22, %v36_v26  ;;  %v62_v35 = vmul.f32 %v838_v30, %v56_v27 }
  0x89   :  { %v43_v33 = vadd.f32 %v42_v29, %v33_v28 }
  0x8b   :  { %v53_v34 = vadd.f32 %v52_v32, %v43_v33  ;;  %v66_v36 = vpop.permute.xlu1 %65 }
  0x8c   :  { %v72_v37 = vmul.f32 %v841_v31, %v66_v36 }
  0x8d   :  { %v63_v38 = vadd.f32 %v62_v35, %v53_v34  ;;  %v744_v34 = vmov 10  }
  0x8f   :  { %v73_v39 = vadd.f32 %v72_v37, %v63_v38 }
  0x91   :  { %v573_v40 = vmul.f32 -1.442695, %v73_v39  ;;  %v745_v39 = vmov 11  }
  0x93   :  { %683 = vpow2.f32 %v573_v40  ;;  %v746_v40 = vmov 13  }
  0x9d   :  { %v684_v41 = vpop.eup %683 }
  0x9e   :  { %v77_v42 = vadd.f32 1.0, %v684_v41  ;;  %v747_v41 = vmov 14  }
  0xa0   :  { %685 = vrcp.f32 %v77_v42 }
  0xaa   :  { %v686_v43 = vpop.eup %685 }
  0xab   :  { %v80_v44 = vmul.f32 2.0, %v686_v43  ;;  %v82_v48 = vmul.f32 0.0, %v686_v43 }
  0xad   :  { %v574_v45 = vadd.f32 -1.0, %v80_v44  ;;  %v748_v44 = vmov 12  }
  0xaf   :  { %84 = vrot.lane.b32.xlu0 %v574_v45, %s736_s1 }
 0x121   :  { %v85_v46 = vpop.permute.xlu0 %84 }
 0x122   :  { %v87_v47 = vmul.f32 %v686_v43, %v85_v46 }
 0x124   :  { %89 = vrot.lane.b32.xlu1 %v87_v47, %s737_s12 }
 0x196   :  { %v90_v49 = vpop.permute.xlu1 %89 }
 0x197   :  { %v92_v50 = vadd.f32 %v90_v49, %v82_v48 }
 0x199   :  { %687 = vtanh.f32 %v92_v50 }
 0x1a3   :  { %v688_v52 = vpop.eup %687 }
 0x1a4   :  { %95 = vrot.lane.b32.xlu0 %v688_v52, %s739_s13 }
 0x1a8   :  { %107 = vperm.xlu0 %638, %v793_v2  }
 0x1ac   :  { %642 = vset.pattern.permute.xlu0 %v740_v53 }
 0x1ad   :  { %125 = vperm.xlu0 %642, %v793_v2  }
 0x1b1   :  { %646 = vset.pattern.permute.xlu0 %v734_v4 }
 0x216   :  { %v96_v54 = vpop.permute.xlu0 %95 }
 0x217   :  { %v98_v55 = vmul.f32 %v686_v43, %v96_v54 }
 0x219   :  { %101 = vperm.xlu1 %639, %v98_v55  }
 0x21d   :  { %640 = vset.pattern.permute.xlu1 %v741_v56 }
 0x21e   :  { %113 = vperm.xlu1 %640, %v793_v2  }
 0x222   :  { %641 = vset.pattern.permute.xlu1 %v742_v57 }
 0x223   :  { %119 = vperm.xlu1 %641, %v793_v2  }
 0x227   :  { %643 = vset.pattern.permute.xlu1 %v743_v58  ;;  %v108_v60 = vpop.permute.xlu0 %107 }
 0x228   :  { %131 = vperm.xlu1 %643, %v793_v2   ;;  %v110_v63 = vmul.f32 %v108_v60, %v822_v15 }
 0x22c   :  { %v126_v8 = vpop.permute.xlu0 %125  ;;  %644 = vset.pattern.permute.xlu1 %v744_v34 }
 0x22d   :  { %v128_v16 = vmul.f32 %v126_v8, %v838_v30 }
 0x298   :  { %v102_v59 = vpop.permute.xlu1 %101 }
 0x299   :  { %v104_v61 = vmul.f32 %v102_v59, %v813_v10 }
 0x29b   :  { %v105_v62 = vadd.f32 %v104_v61, %v819_v14 }
 0x29d   :  { %v114_v0 = vpop.permute.xlu1 %113  ;;  %v111_v1 = vadd.f32 %v110_v63, %v105_v62 }
 0x29e   :  { %v116_v5 = vmul.f32 %v114_v0, %v829_v22 }
 0x2a0   :  { %v117_v12 = vadd.f32 %v116_v5, %v111_v1 }
 0x2a2   :  { %v120_v11 = vpop.permute.xlu1 %119 }
 0x2a3   :  { %v122_v13 = vmul.f32 %v120_v11, %v834_v25 }
 0x2a5   :  { %v123_v17 = vadd.f32 %v122_v13, %v117_v12 }
 0x2a7   :  { %v129_v18 = vadd.f32 %v128_v16, %v123_v17  ;;  %v132_v19 = vpop.permute.xlu1 %131 }
 0x2a8   :  { %v134_v20 = vmul.f32 %v132_v19, %v841_v31  ;;  %v749_v19 = vmov 15  }
 0x2aa   :  { %v135_v21 = vadd.f32 %v134_v20, %v129_v18 }
 0x2ac   :  { %v575_v23 = vmul.f32 -1.442695, %v135_v21  ;;  %v750_v21 = vmov 18  }
 0x2ae   :  { %689 = vpow2.f32 %v575_v23 }
 0x2b8   :  { %v690_v24 = vpop.eup %689 }
 0x2b9   :  { %v139_v26 = vadd.f32 1.0, %v690_v24 }
 0x2bb   :  { %691 = vrcp.f32 %v139_v26  ;;  %v751_v26 = vmov 16  }
 0x2c5   :  { %v692_v27 = vpop.eup %691 }
 0x2c6   :  { %v142_v28 = vmul.f32 2.0, %v692_v27  ;;  %v144_v35 = vmul.f32 %v692_v27, %v92_v50 }
 0x2c8   :  { %v576_v29 = vadd.f32 -1.0, %v142_v28  ;;  %v753_v28 = vmov 19  }
 0x2ca   :  { %146 = vrot.lane.b32.xlu1 %v576_v29, %s736_s1 }
 0x33c   :  { %v147_v32 = vpop.permute.xlu1 %146 }
 0x33d   :  { %v149_v33 = vmul.f32 %v692_v27, %v147_v32 }
 0x33f   :  { %151 = vrot.lane.b32.xlu0 %v149_v33, %s737_s12 }
 0x3b1   :  { %v152_v36 = vpop.permute.xlu0 %151 }
 0x3b2   :  { %v154_v37 = vadd.f32 %v152_v36, %v144_v35 }
 0x3b4   :  { %693 = vtanh.f32 %v154_v37 }
 0x3be   :  { %v694_v38 = vpop.eup %693 }
 0x3bf   :  { %157 = vrot.lane.b32.xlu1 %v694_v38, %s739_s13 }
 0x3c3   :  { %169 = vperm.xlu1 %644, %v793_v2  }
 0x3c7   :  { %645 = vset.pattern.permute.xlu1 %v745_v39 }
 0x3c8   :  { %175 = vperm.xlu1 %645, %v793_v2  }
 0x3cc   :  { %648 = vset.pattern.permute.xlu1 %v746_v40 }
 0x3cd   :  { %187 = vperm.xlu1 %648, %v793_v2  }
 0x3d1   :  { %649 = vset.pattern.permute.xlu1 %v747_v41 }
 0x3d2   :  { %193 = vperm.xlu1 %649, %v793_v2  }
 0x3d6   :  { %651 = vset.pattern.permute.xlu1 %v734_v4 }
 0x431   :  { %v158_v42 = vpop.permute.xlu1 %157 }
 0x432   :  { %v160_v43 = vmul.f32 %v692_v27, %v158_v42  ;;  %v752_v27 = vmov 17  }
 0x434   :  { %163 = vperm.xlu0 %646, %v160_v43  }
 0x438   :  { %647 = vset.pattern.permute.xlu0 %v748_v44 }
 0x439   :  { %181 = vperm.xlu0 %647, %v793_v2  }
 0x43d   :  { %650 = vset.pattern.permute.xlu0 %v749_v19 }
 0x442   :  { %v170_v45 = vpop.permute.xlu1 %169 }
 0x443   :  { %v172_v50 = vmul.f32 %v170_v45, %v822_v15 }
 0x447   :  { %v176_v46 = vpop.permute.xlu1 %175 }
 0x448   :  { %v178_v53 = vmul.f32 %v176_v46, %v829_v22 }
 0x44c   :  { %v188_v48 = vpop.permute.xlu1 %187 }
 0x44d   :  { %v190_v58 = vmul.f32 %v188_v48, %v838_v30 }
 0x451   :  { %v194_v56 = vpop.permute.xlu1 %193 }
 0x452   :  { %v196_v60 = vmul.f32 %v194_v56, %v841_v31 }
 0x4b3   :  { %v164_v47 = vpop.permute.xlu0 %163 }
 0x4b4   :  { %v166_v49 = vmul.f32 %v164_v47, %v813_v10 }
 0x4b6   :  { %v167_v51 = vadd.f32 %v166_v49, %v819_v14 }
 0x4b8   :  { %v173_v52 = vadd.f32 %v172_v50, %v167_v51  ;;  %v182_v54 = vpop.permute.xlu0 %181 }
 0x4b9   :  { %v184_v55 = vmul.f32 %v182_v54, %v834_v25 }
 0x4ba   :  { %v179_v57 = vadd.f32 %v178_v53, %v173_v52 }
 0x4bc   :  { %v185_v59 = vadd.f32 %v184_v55, %v179_v57  ;;  %v754_v57 = vmov 20  }
 0x4be   :  { %v191_v61 = vadd.f32 %v190_v58, %v185_v59 }
 0x4c0   :  { %v197_v62 = vadd.f32 %v196_v60, %v191_v61 }
 0x4c2   :  { %v577_v63 = vmul.f32 -1.442695, %v197_v62  ;;  %v755_v62 = vmov 21  }
 0x4c4   :  { %695 = vpow2.f32 %v577_v63  ;;  %v756_v63 = vmov 23  }
 0x4ce   :  { %v696_v0 = vpop.eup %695 }
 0x4cf   :  { %v201_v1 = vadd.f32 1.0, %v696_v0  ;;  %v757_v0 = vmov 24  }
 0x4d1   :  { %697 = vrcp.f32 %v201_v1 }
 0x4db   :  { %v698_v5 = vpop.eup %697 }
 0x4dc   :  { %v204_v8 = vmul.f32 2.0, %v698_v5  ;;  %v206_v16 = vmul.f32 %v698_v5, %v154_v37 }
 0x4de   :  { %v578_v11 = vadd.f32 -1.0, %v204_v8  ;;  %v758_v8 = vmov 22  }
 0x4e0   :  { %208 = vrot.lane.b32.xlu0 %v578_v11, %s736_s1 }
 0x552   :  { %v209_v12 = vpop.permute.xlu0 %208 }
 0x553   :  { %v211_v13 = vmul.f32 %v698_v5, %v209_v12 }
 0x555   :  { %213 = vrot.lane.b32.xlu1 %v211_v13, %s737_s12 }
 0x5c7   :  { %v214_v17 = vpop.permute.xlu1 %213 }
 0x5c8   :  { %v216_v18 = vadd.f32 %v214_v17, %v206_v16 }
 0x5ca   :  { %699 = vtanh.f32 %v216_v18 }
 0x5d4   :  { %v700_v20 = vpop.eup %699 }
 0x5d5   :  { %219 = vrot.lane.b32.xlu0 %v700_v20, %s739_s13 }
 0x5d9   :  { %231 = vperm.xlu0 %650, %v793_v2  }
 0x5dd   :  { %654 = vset.pattern.permute.xlu0 %v750_v21 }
 0x5de   :  { %249 = vperm.xlu0 %654, %v793_v2  }
 0x5e2   :  { %658 = vset.pattern.permute.xlu0 %v734_v4 }
 0x647   :  { %v220_v23 = vpop.permute.xlu0 %219 }
 0x648   :  { %v222_v24 = vmul.f32 %v698_v5, %v220_v23 }
 0x64a   :  { %225 = vperm.xlu1 %651, %v222_v24  }
 0x64e   :  { %652 = vset.pattern.permute.xlu1 %v751_v26 }
 0x64f   :  { %237 = vperm.xlu1 %652, %v793_v2  }
 0x653   :  { %653 = vset.pattern.permute.xlu1 %v752_v27 }
 0x654   :  { %243 = vperm.xlu1 %653, %v793_v2  }
 0x658   :  { %655 = vset.pattern.permute.xlu1 %v753_v28  ;;  %v232_v32 = vpop.permute.xlu0 %231 }
 0x659   :  { %255 = vperm.xlu1 %655, %v793_v2   ;;  %v234_v35 = vmul.f32 %v232_v32, %v822_v15 }
 0x65d   :  { %v250_v39 = vpop.permute.xlu0 %249  ;;  %656 = vset.pattern.permute.xlu1 %v754_v57 }
 0x65e   :  { %v252_v43 = vmul.f32 %v250_v39, %v838_v30 }
 0x6c9   :  { %v226_v29 = vpop.permute.xlu1 %225 }
 0x6ca   :  { %v228_v33 = vmul.f32 %v226_v29, %v813_v10 }
 0x6cc   :  { %v229_v34 = vadd.f32 %v228_v33, %v819_v14 }
 0x6ce   :  { %v238_v36 = vpop.permute.xlu1 %237  ;;  %v235_v37 = vadd.f32 %v234_v35, %v229_v34 }
 0x6cf   :  { %v240_v38 = vmul.f32 %v238_v36, %v829_v22 }
 0x6d1   :  { %v241_v41 = vadd.f32 %v240_v38, %v235_v37 }
 0x6d3   :  { %v244_v40 = vpop.permute.xlu1 %243 }
 0x6d4   :  { %v246_v42 = vmul.f32 %v244_v40, %v834_v25 }
 0x6d6   :  { %v247_v44 = vadd.f32 %v246_v42, %v241_v41 }
 0x6d8   :  { %v253_v45 = vadd.f32 %v252_v43, %v247_v44  ;;  %v256_v46 = vpop.permute.xlu1 %255 }
 0x6d9   :  { %v258_v47 = vmul.f32 %v256_v46, %v841_v31  ;;  %v759_v46 = vmov 25  }
 0x6db   :  { %v259_v48 = vadd.f32 %v258_v47, %v253_v45 }
 0x6dd   :  { %v579_v49 = vmul.f32 -1.442695, %v259_v48  ;;  %v760_v48 = vmov 28  }
 0x6df   :  { %701 = vpow2.f32 %v579_v49 }
 0x6e9   :  { %v702_v50 = vpop.eup %701 }
 0x6ea   :  { %v263_v51 = vadd.f32 1.0, %v702_v50 }
 0x6ec   :  { %703 = vrcp.f32 %v263_v51  ;;  %v761_v51 = vmov 26  }
 0x6f6   :  { %v704_v52 = vpop.eup %703 }
 0x6f7   :  { %v266_v53 = vmul.f32 2.0, %v704_v52  ;;  %v268_v58 = vmul.f32 %v704_v52, %v216_v18 }
 0x6f9   :  { %v580_v54 = vadd.f32 -1.0, %v266_v53  ;;  %v763_v53 = vmov 29  }
 0x6fb   :  { %270 = vrot.lane.b32.xlu1 %v580_v54, %s736_s1 }
 0x76d   :  { %v271_v55 = vpop.permute.xlu1 %270 }
 0x76e   :  { %v273_v56 = vmul.f32 %v704_v52, %v271_v55 }
 0x770   :  { %275 = vrot.lane.b32.xlu0 %v273_v56, %s737_s12 }
 0x7e2   :  { %v276_v59 = vpop.permute.xlu0 %275 }
 0x7e3   :  { %v278_v60 = vadd.f32 %v276_v59, %v268_v58 }
 0x7e5   :  { %705 = vtanh.f32 %v278_v60 }
 0x7ef   :  { %v706_v61 = vpop.eup %705 }
 0x7f0   :  { %281 = vrot.lane.b32.xlu1 %v706_v61, %s739_s13 }
 0x7f4   :  { %293 = vperm.xlu1 %656, %v793_v2  }
 0x7f8   :  { %657 = vset.pattern.permute.xlu1 %v755_v62 }
 0x7f9   :  { %299 = vperm.xlu1 %657, %v793_v2  }
 0x7fd   :  { %660 = vset.pattern.permute.xlu1 %v756_v63 }
 0x7fe   :  { %311 = vperm.xlu1 %660, %v793_v2  }
 0x802   :  { %661 = vset.pattern.permute.xlu1 %v757_v0 }
 0x803   :  { %317 = vperm.xlu1 %661, %v793_v2  }
 0x807   :  { %663 = vset.pattern.permute.xlu1 %v734_v4 }
 0x862   :  { %v282_v1 = vpop.permute.xlu1 %281 }
 0x863   :  { %v284_v5 = vmul.f32 %v704_v52, %v282_v1  ;;  %v762_v52 = vmov 27  }
 0x865   :  { %287 = vperm.xlu0 %658, %v284_v5  }
 0x869   :  { %659 = vset.pattern.permute.xlu0 %v758_v8 }
 0x86a   :  { %305 = vperm.xlu0 %659, %v793_v2  }
 0x86e   :  { %662 = vset.pattern.permute.xlu0 %v759_v46 }
 0x873   :  { %v294_v11 = vpop.permute.xlu1 %293 }
 0x874   :  { %v296_v18 = vmul.f32 %v294_v11, %v822_v15 }
 0x878   :  { %v300_v12 = vpop.permute.xlu1 %299 }
 0x879   :  { %v302_v21 = vmul.f32 %v300_v12, %v829_v22 }
 0x87d   :  { %v312_v16 = vpop.permute.xlu1 %311 }
 0x87e   :  { %v314_v28 = vmul.f32 %v312_v16, %v838_v30 }
 0x882   :  { %v318_v26 = vpop.permute.xlu1 %317 }
 0x883   :  { %v320_v32 = vmul.f32 %v318_v26, %v841_v31 }
 0x8e4   :  { %v288_v13 = vpop.permute.xlu0 %287 }
 0x8e5   :  { %v290_v17 = vmul.f32 %v288_v13, %v813_v10 }
 0x8e7   :  { %v291_v19 = vadd.f32 %v290_v17, %v819_v14 }
 0x8e9   :  { %v297_v20 = vadd.f32 %v296_v18, %v291_v19  ;;  %v306_v23 = vpop.permute.xlu0 %305 }
 0x8ea   :  { %v308_v24 = vmul.f32 %v306_v23, %v834_v25 }
 0x8eb   :  { %v303_v27 = vadd.f32 %v302_v21, %v297_v20 }
 0x8ed   :  { %v309_v29 = vadd.f32 %v308_v24, %v303_v27  ;;  %v764_v27 = vmov 30  }
 0x8ef   :  { %v315_v33 = vadd.f32 %v314_v28, %v309_v29 }
 0x8f1   :  { %v321_v34 = vadd.f32 %v320_v32, %v315_v33 }
 0x8f3   :  { %v581_v35 = vmul.f32 -1.442695, %v321_v34  ;;  %v765_v34 = vmov 31  }
 0x8f5   :  { %707 = vpow2.f32 %v581_v35  ;;  %v766_v35 = vmov 33  }
 0x8ff   :  { %v708_v36 = vpop.eup %707 }
 0x900   :  { %v325_v37 = vadd.f32 1.0, %v708_v36  ;;  %v767_v36 = vmov 34  }
 0x902   :  { %709 = vrcp.f32 %v325_v37 }
 0x90c   :  { %v710_v38 = vpop.eup %709 }
 0x90d   :  { %v328_v39 = vmul.f32 2.0, %v710_v38  ;;  %v330_v43 = vmul.f32 %v710_v38, %v278_v60 }
 0x90f   :  { %v582_v40 = vadd.f32 -1.0, %v328_v39  ;;  %v768_v39 = vmov 32  }
 0x911   :  { %332 = vrot.lane.b32.xlu0 %v582_v40, %s736_s1 }
 0x983   :  { %v333_v41 = vpop.permute.xlu0 %332 }
 0x984   :  { %v335_v42 = vmul.f32 %v710_v38, %v333_v41 }
 0x986   :  { %337 = vrot.lane.b32.xlu1 %v335_v42, %s737_s12 }
 0x9f8   :  { %v338_v44 = vpop.permute.xlu1 %337 }
 0x9f9   :  { %v340_v45 = vadd.f32 %v338_v44, %v330_v43 }
 0x9fb   :  { %711 = vtanh.f32 %v340_v45 }
 0xa05   :  { %v712_v47 = vpop.eup %711 }
 0xa06   :  { %343 = vrot.lane.b32.xlu0 %v712_v47, %s739_s13 }
 0xa0a   :  { %355 = vperm.xlu0 %662, %v793_v2  }
 0xa0e   :  { %666 = vset.pattern.permute.xlu0 %v760_v48 }
 0xa0f   :  { %373 = vperm.xlu0 %666, %v793_v2  }
 0xa13   :  { %670 = vset.pattern.permute.xlu0 %v734_v4 }
 0xa78   :  { %v344_v49 = vpop.permute.xlu0 %343 }
 0xa79   :  { %v346_v50 = vmul.f32 %v710_v38, %v344_v49 }
 0xa7b   :  { %349 = vperm.xlu1 %663, %v346_v50  }
 0xa7f   :  { %664 = vset.pattern.permute.xlu1 %v761_v51 }
 0xa80   :  { %361 = vperm.xlu1 %664, %v793_v2  }
 0xa84   :  { %665 = vset.pattern.permute.xlu1 %v762_v52 }
 0xa85   :  { %367 = vperm.xlu1 %665, %v793_v2  }
 0xa89   :  { %667 = vset.pattern.permute.xlu1 %v763_v53  ;;  %v356_v55 = vpop.permute.xlu0 %355 }
 0xa8a   :  { %379 = vperm.xlu1 %667, %v793_v2   ;;  %v358_v58 = vmul.f32 %v356_v55, %v822_v15 }
 0xa8e   :  { %v374_v62 = vpop.permute.xlu0 %373  ;;  %668 = vset.pattern.permute.xlu1 %v764_v27 }
 0xa8f   :  { %v376_v5 = vmul.f32 %v374_v62, %v838_v30 }
 0xafa   :  { %v350_v54 = vpop.permute.xlu1 %349 }
 0xafb   :  { %v352_v56 = vmul.f32 %v350_v54, %v813_v10 }
 0xafd   :  { %v353_v57 = vadd.f32 %v352_v56, %v819_v14 }
 0xaff   :  { %v362_v59 = vpop.permute.xlu1 %361  ;;  %v359_v60 = vadd.f32 %v358_v58, %v353_v57 }
 0xb00   :  { %v364_v61 = vmul.f32 %v362_v59, %v829_v22 }
 0xb02   :  { %v365_v0 = vadd.f32 %v364_v61, %v359_v60 }
 0xb04   :  { %v368_v63 = vpop.permute.xlu1 %367 }
 0xb05   :  { %v370_v1 = vmul.f32 %v368_v63, %v834_v25 }
 0xb07   :  { %v371_v8 = vadd.f32 %v370_v1, %v365_v0 }
 0xb09   :  { %v377_v11 = vadd.f32 %v376_v5, %v371_v8  ;;  %v380_v12 = vpop.permute.xlu1 %379 }
 0xb0a   :  { %v382_v13 = vmul.f32 %v380_v12, %v841_v31  ;;  %v769_v12 = vmov 35  }
 0xb0c   :  { %v383_v16 = vadd.f32 %v382_v13, %v377_v11 }
 0xb0e   :  { %v583_v17 = vmul.f32 -1.442695, %v383_v16  ;;  %v770_v16 = vmov 38  }
 0xb10   :  { %713 = vpow2.f32 %v583_v17 }
 0xb1a   :  { %v714_v18 = vpop.eup %713 }
 0xb1b   :  { %v387_v19 = vadd.f32 1.0, %v714_v18 }
 0xb1d   :  { %715 = vrcp.f32 %v387_v19  ;;  %v771_v19 = vmov 36  }
 0xb27   :  { %v716_v20 = vpop.eup %715 }
 0xb28   :  { %v390_v21 = vmul.f32 2.0, %v716_v20  ;;  %v392_v28 = vmul.f32 %v716_v20, %v340_v45 }
 0xb2a   :  { %v584_v23 = vadd.f32 -1.0, %v390_v21  ;;  %v773_v21 = vmov 39  }
 0xb2c   :  { %394 = vrot.lane.b32.xlu1 %v584_v23, %s736_s1 }
 0xb9e   :  { %v395_v24 = vpop.permute.xlu1 %394 }
 0xb9f   :  { %v397_v26 = vmul.f32 %v716_v20, %v395_v24 }
 0xba1   :  { %399 = vrot.lane.b32.xlu0 %v397_v26, %s737_s12 }
 0xc13   :  { %v400_v29 = vpop.permute.xlu0 %399 }
 0xc14   :  { %v402_v32 = vadd.f32 %v400_v29, %v392_v28 }
 0xc16   :  { %717 = vtanh.f32 %v402_v32 }
 0xc20   :  { %v718_v33 = vpop.eup %717 }
 0xc21   :  { %405 = vrot.lane.b32.xlu1 %v718_v33, %s739_s13 }
 0xc25   :  { %417 = vperm.xlu1 %668, %v793_v2  }
 0xc29   :  { %669 = vset.pattern.permute.xlu1 %v765_v34 }
 0xc2a   :  { %423 = vperm.xlu1 %669, %v793_v2  }
 0xc2e   :  { %672 = vset.pattern.permute.xlu1 %v766_v35 }
 0xc2f   :  { %435 = vperm.xlu1 %672, %v793_v2  }
 0xc33   :  { %673 = vset.pattern.permute.xlu1 %v767_v36 }
 0xc34   :  { %441 = vperm.xlu1 %673, %v793_v2  }
 0xc38   :  { %675 = vset.pattern.permute.xlu1 %v734_v4 }
 0xc93   :  { %v406_v37 = vpop.permute.xlu1 %405 }
 0xc94   :  { %v408_v38 = vmul.f32 %v716_v20, %v406_v37  ;;  %v772_v20 = vmov 37  }
 0xc96   :  { %411 = vperm.xlu0 %670, %v408_v38  }
 0xc9a   :  { %671 = vset.pattern.permute.xlu0 %v768_v39 }
 0xc9b   :  { %429 = vperm.xlu0 %671, %v793_v2  }
 0xc9f   :  { %674 = vset.pattern.permute.xlu0 %v769_v12 }
 0xca4   :  { %v418_v40 = vpop.permute.xlu1 %417 }
 0xca5   :  { %v420_v45 = vmul.f32 %v418_v40, %v822_v15 }
 0xca9   :  { %v424_v41 = vpop.permute.xlu1 %423 }
 0xcaa   :  { %v426_v48 = vmul.f32 %v424_v41, %v829_v22 }
 0xcae   :  { %v436_v43 = vpop.permute.xlu1 %435 }
 0xcaf   :  { %v438_v53 = vmul.f32 %v436_v43, %v838_v30 }
 0xcb3   :  { %v442_v51 = vpop.permute.xlu1 %441 }
 0xcb4   :  { %v444_v55 = vmul.f32 %v442_v51, %v841_v31 }
 0xd15   :  { %v412_v42 = vpop.permute.xlu0 %411 }
 0xd16   :  { %v414_v44 = vmul.f32 %v412_v42, %v813_v10 }
 0xd18   :  { %v415_v46 = vadd.f32 %v414_v44, %v819_v14 }
 0xd1a   :  { %v421_v47 = vadd.f32 %v420_v45, %v415_v46  ;;  %v430_v49 = vpop.permute.xlu0 %429 }
 0xd1b   :  { %v432_v50 = vmul.f32 %v430_v49, %v834_v25 }
 0xd1c   :  { %v427_v52 = vadd.f32 %v426_v48, %v421_v47 }
 0xd1e   :  { %v433_v54 = vadd.f32 %v432_v50, %v427_v52 }
 0xd20   :  { %v439_v56 = vadd.f32 %v438_v53, %v433_v54  ;;  %v547_v53 = vand.u32 127, %v13_v6 }
 0xd22   :  { %v445_v57 = vadd.f32 %v444_v55, %v439_v56  ;;  %vm549_vm0 = vcmp.eq.s32.totalorder %v547_v53, 1  ;;  %vm548_vm1 = vcmp.eq.s32.totalorder %v547_v53, 0 }
 0xd24   :  { %v585_v58 = vmul.f32 -1.442695, %v445_v57 }
 0xd26   :  { %719 = vpow2.f32 %v585_v58 }
 0xd30   :  { %v720_v59 = vpop.eup %719 }
 0xd31   :  { %v449_v60 = vadd.f32 1.0, %v720_v59 }
 0xd33   :  { %721 = vrcp.f32 %v449_v60 }
 0xd3d   :  { %v722_v61 = vpop.eup %721 }
 0xd3e   :  { %v452_v62 = vmul.f32 2.0, %v722_v61  ;;  %v454_v5 = vmul.f32 %v722_v61, %v402_v32 }
 0xd40   :  { %v586_v63 = vadd.f32 -1.0, %v452_v62 }
 0xd42   :  { %456 = vrot.lane.b32.xlu0 %v586_v63, %s736_s1 }
 0xdb4   :  { %v457_v0 = vpop.permute.xlu0 %456 }
 0xdb5   :  { %v459_v1 = vmul.f32 %v722_v61, %v457_v0 }
 0xdb7   :  { %461 = vrot.lane.b32.xlu1 %v459_v1, %s737_s12 }
 0xe29   :  { %v462_v8 = vpop.permute.xlu1 %461 }
 0xe2a   :  { %v464_v11 = vadd.f32 %v462_v8, %v454_v5 }
 0xe2c   :  { %723 = vtanh.f32 %v464_v11 }
 0xe36   :  { %v724_v13 = vpop.eup %723 }
 0xe37   :  { %467 = vrot.lane.b32.xlu0 %v724_v13, %s739_s13 }
 0xe3b   :  { %479 = vperm.xlu0 %674, %v793_v2  }
 0xe3f   :  { %678 = vset.pattern.permute.xlu0 %v770_v16 }
 0xe40   :  { %497 = vperm.xlu0 %678, %v793_v2  }
 0xe44   :  { %680 = vset.pattern.permute.xlu0 %v734_v4 }
 0xea9   :  { %v468_v17 = vpop.permute.xlu0 %467 }
 0xeaa   :  { %v470_v18 = vmul.f32 %v722_v61, %v468_v17 }
 0xeac   :  { %473 = vperm.xlu1 %675, %v470_v18  }
 0xeb0   :  { %676 = vset.pattern.permute.xlu1 %v771_v19 }
 0xeb1   :  { %485 = vperm.xlu1 %676, %v793_v2  }
 0xeb5   :  { %677 = vset.pattern.permute.xlu1 %v772_v20 }
 0xeb6   :  { %491 = vperm.xlu1 %677, %v793_v2  }
 0xeba   :  { %679 = vset.pattern.permute.xlu1 %v773_v21  ;;  %v480_v24 = vpop.permute.xlu0 %479 }
 0xebb   :  { %503 = vperm.xlu1 %679, %v793_v2   ;;  %v482_v28 = vmul.f32 %v480_v24, %v822_v15 }
 0xebf   :  { %681 = vset.pattern.permute.xlu1 %v733_v3  ;;  %v498_v34 = vpop.permute.xlu0 %497 }
 0xec0   :  { %v500_v2 = vmul.f32 %v498_v34, %v838_v30  ;;  %v535_v30 = vsub.s32 7, %v804_v7 }
 0xec2   :  { %v536_v45 = vrot.slane %v810_v9, %v535_v30 }
 0xf2b   :  { %v474_v23 = vpop.permute.xlu1 %473 }
 0xf2c   :  { %v476_v26 = vmul.f32 %v474_v23, %v813_v10 }
 0xf2e   :  { %v477_v27 = vadd.f32 %v476_v26, %v819_v14 }
 0xf30   :  { %v486_v29 = vpop.permute.xlu1 %485  ;;  %v483_v32 = vadd.f32 %v482_v28, %v477_v27 }
 0xf31   :  { %v488_v33 = vmul.f32 %v486_v29, %v829_v22 }
 0xf33   :  { %v489_v36 = vadd.f32 %v488_v33, %v483_v32 }
 0xf35   :  { %v492_v35 = vpop.permute.xlu1 %491 }
 0xf36   :  { %v494_v37 = vmul.f32 %v492_v35, %v834_v25 }
 0xf38   :  { %v495_v3 = vadd.f32 %v494_v37, %v489_v36 }
 0xf3a   :  { %v501_v38 = vadd.f32 %v500_v2, %v495_v3  ;;  %v504_v39 = vpop.permute.xlu1 %503 }
 0xf3b   :  { %v506_v10 = vmul.f32 %v504_v39, %v841_v31 }
 0xf3d   :  { %v507_v40 = vadd.f32 %v506_v10, %v501_v38 }
 0xf3f   :  { %v587_v14 = vmul.f32 -1.442695, %v507_v40 }
 0xf41   :  { %725 = vpow2.f32 %v587_v14 }
 0xf4b   :  { %v726_v15 = vpop.eup %725 }
 0xf4c   :  { %v511_v41 = vadd.f32 1.0, %v726_v15 }
 0xf4e   :  { %727 = vrcp.f32 %v511_v41 }
 0xf58   :  { %v728_v42 = vpop.eup %727 }
 0xf59   :  { %v514_v22 = vmul.f32 2.0, %v728_v42  ;;  %v516_v31 = vmul.f32 %v728_v42, %v464_v11 }
 0xf5b   :  { %v588_v43 = vadd.f32 -1.0, %v514_v22 }
 0xf5d   :  { %518 = vrot.lane.b32.xlu1 %v588_v43, %s736_s1 }
 0xfcf   :  { %v519_v44 = vpop.permute.xlu1 %518 }
 0xfd0   :  { %v521_v25 = vmul.f32 %v728_v42, %v519_v44 }
 0xfd2   :  { %523 = vrot.lane.b32.xlu0 %v521_v25, %s737_s12 }
 0xfd6   :  { %538 = vrot.lane.b32.xlu0 %v536_v45, %s774_s14 }
0x1044   :  { %v524_v46 = vpop.permute.xlu0 %523 }
0x1045   :  { %v526_v47 = vadd.f32 %v524_v46, %v516_v31 }
0x1047   :  { %729 = vtanh.f32 %v526_v47 }
0x1048   :  { %v539_v7 = vpop.permute.xlu0 %538 }
0x1051   :  { %v730_v48 = vpop.eup %729 }
0x1052   :  { %529 = vrot.lane.b32.xlu1 %v730_v48, %s739_s13 }
0x1056   :  { %542 = vrot.lane.b32.xlu1 %v536_v45, %s739_s13 }
0x105a   :  { %557 = vperm.xlu1 %681, %v526_v47  }
0x105e   :  { %682 = vset.pattern.permute.xlu1 %v734_v4 }
0x10c4   :  { %v530_v49 = vpop.permute.xlu1 %529 }
0x10c5   :  { %v532_v50 = vmul.f32 %v728_v42, %v530_v49 }
0x10c7   :  { %v541_v51 = vmul.f32 %v539_v7, %v532_v50  ;;  %552 = vperm.xlu0 %680, %v532_v50  }
0x10c8   :  { %v543_v9 = vpop.permute.xlu1 %542 }
0x10c9   :  { %v545_v52 = vadd.f32 %v543_v9, %v541_v51 }
0x10cb   :  { %563 = vperm.xlu1 %682, %v545_v52  }
0x10d9   :  { %v558_v54 = vpop.permute.xlu1 %557 }
0x1146   :  { %v553_v55 = vpop.permute.xlu0 %552 }
0x1147   :  { %v560_v56 = vsel %vm549_vm0, %v553_v55, %v558_v54 }
0x114a   :  { %v564_v57 = vpop.permute.xlu1 %563 }
0x114b   :  { %v566_v58 = vsel %vm548_vm1, %v564_v57, %v560_v56 }
0x114c   :  { %568 = vst.msk [vmem:[%s972_s2] sm:$0x3] %vm567_vm2, %v566_v58 }

</bundles_post_ra>
